<compile_context>
chip_gen: v5e
topology: v5e:2x2
jax: 0.10.0
libtpu: 0.0.40
codegen_flags: <defaults>
</compile_context>

<pallas_src>
import jax
import jax.numpy as jnp
from jax.experimental import pallas as pl
from jax.experimental.pallas import tpu as pltpu


# ----------------------------------------------------------------------------
# Pallas kernels
# ----------------------------------------------------------------------------

def _input_proj_kernel(x_ref, w_ref, b_ref, o_ref):
    """One M-tile of: x @ W_ih^T + (b_ih + b_hh).  Output is (tm, 4H), 4H=128."""
    acc = jnp.dot(x_ref[...], w_ref[...], preferred_element_type=jnp.float32)
    o_ref[...] = (acc + b_ref[...]).astype(o_ref.dtype)


def _lstm_step_kernel(xg_ref, whh_ref, wfc_ref, bfc_ref, out_ref, h_ref, c_ref):
    """One timestep of the LSTM recurrence; fc head fused into the last step.

    Grid axis 0 is time (sequential / "arbitrary").  h_ref / c_ref are VMEM
    scratch persisting across grid steps; xg_ref holds the precomputed input
    projection (already includes both biases) for this timestep.
    """
    t = pl.program_id(0)
    H = h_ref.shape[1]

    @pl.when(t == 0)
    def _():
        h_ref[...] = jnp.zeros_like(h_ref)
        c_ref[...] = jnp.zeros_like(c_ref)

    # gates: (B, 4H) = xg_t + h_{t-1} @ W_hh^T    (PyTorch gate order i, f, g, o)
    gates = xg_ref[0] + jnp.dot(h_ref[...], whh_ref[...],
                                preferred_element_type=jnp.float32)
    i_g = jax.nn.sigmoid(gates[:, 0 * H:1 * H])
    f_g = jax.nn.sigmoid(gates[:, 1 * H:2 * H])
    g_g = jnp.tanh(gates[:, 2 * H:3 * H])
    o_g = jax.nn.sigmoid(gates[:, 3 * H:4 * H])

    c_new = f_g * c_ref[...] + i_g * g_g
    h_new = o_g * jnp.tanh(c_new)
    c_ref[...] = c_new
    h_ref[...] = h_new

    @pl.when(t == pl.num_programs(0) - 1)
    def _():
        logits = jnp.dot(h_new, wfc_ref[...],
                         preferred_element_type=jnp.float32) + bfc_ref[...]
        out_ref[...] = logits.astype(out_ref.dtype)


# ----------------------------------------------------------------------------
# Pallas wrappers
# ----------------------------------------------------------------------------

def lstm_input_projection(x_tbd, w_ih_t, b_gates, tm=1024):
    """x_tbd: (T, B, D) -> (T, B, 4H) = x @ w_ih_t + b_gates.

    Flattened to an M-tiled matmul (M = T*B) so all timesteps are computed in
    one parallel pallas_call with a large tile size.
    """
    T, B, D = x_tbd.shape
    G = w_ih_t.shape[1]                       # 4H
    M = T * B
    x2d = x_tbd.reshape(M, D)

    tm = min(tm, M)
    m_pad = pl.cdiv(M, tm) * tm
    if m_pad != M:
        x2d = jnp.pad(x2d, ((0, m_pad - M), (0, 0)))

    out = pl.pallas_call(
        _input_proj_kernel,
        out_shape=jax.ShapeDtypeStruct((m_pad, G), jnp.float32),
        grid=(m_pad // tm,),
        in_specs=[
            pl.BlockSpec((tm, D), lambda i: (i, 0)),
            pl.BlockSpec((D, G), lambda i: (0, 0)),
            pl.BlockSpec((1, G), lambda i: (0, 0)),
        ],
        out_specs=pl.BlockSpec((tm, G), lambda i: (i, 0)),
        compiler_params=pltpu.CompilerParams(
            dimension_semantics=("parallel",)),
    )(x2d, w_ih_t, b_gates)
    return out[:M].reshape(T, B, G)


def lstm_recurrence_fc(xg, w_hh_t, w_fc_t, b_fc):
    """xg: (T, B, 4H) precomputed input gates -> logits (B, O)."""
    T, B, G = xg.shape
    H = w_hh_t.shape[0]
    O = w_fc_t.shape[1]
    return pl.pallas_call(
        _lstm_step_kernel,
        out_shape=jax.ShapeDtypeStruct((B, O), jnp.float32),
        grid=(T,),
        in_specs=[
            pl.BlockSpec((1, B, G), lambda t: (t, 0, 0)),   # this timestep's gates
            pl.BlockSpec((H, G), lambda t: (0, 0)),          # W_hh^T (resident)
            pl.BlockSpec((H, O), lambda t: (0, 0)),          # W_fc^T (resident)
            pl.BlockSpec((1, O), lambda t: (0, 0)),          # b_fc   (resident)
        ],
        out_specs=pl.BlockSpec((B, O), lambda t: (0, 0)),     # written at t == T-1
        scratch_shapes=[
            pltpu.VMEM((B, H), jnp.float32),                  # h
            pltpu.VMEM((B, H), jnp.float32),                  # c
        ],
        compiler_params=pltpu.CompilerParams(
            dimension_semantics=("arbitrary",)),              # time is sequential
    )(xg, w_hh_t, w_fc_t, b_fc)


# ----------------------------------------------------------------------------
# Model: parameters + forward
# ----------------------------------------------------------------------------

INPUT_SIZE = 16
HIDDEN_SIZE = 32        # 4 * HIDDEN_SIZE = 128 -> lane-dense gate layout
OUTPUT_SIZE = 6


def init_params(key, input_size=INPUT_SIZE, hidden_size=HIDDEN_SIZE,
                output_size=OUTPUT_SIZE):
    """Parameters in PyTorch layout, stored transposed for lane-dense matmuls."""
    k = jax.random.split(key, 6)
    G = 4 * hidden_size
    w_ih = jax.random.normal(k[0], (G, input_size), jnp.float32) * 0.1   # (4H, D)
    w_hh = jax.random.normal(k[1], (G, hidden_size), jnp.float32) * 0.1  # (4H, H)
    b_ih = jax.random.normal(k[2], (G,), jnp.float32) * 0.1
    b_hh = jax.random.normal(k[3], (G,), jnp.float32) * 0.1
    w_fc = jax.random.normal(k[4], (output_size, hidden_size), jnp.float32) * 0.1
    b_fc = jax.random.normal(k[5], (output_size,), jnp.float32) * 0.1
    return {
        "w_ih_t": w_ih.T,                              # (D, 4H)
        "w_hh_t": w_hh.T,                              # (H, 4H)
        "b_gates": (b_ih + b_hh).reshape(1, G),        # biases folded together
        "w_fc_t": w_fc.T,                              # (H, O)
        "b_fc": b_fc.reshape(1, output_size),          # (1, O)
    }


def forward(params, x):
    """x: (B, T, D), batch_first like the PyTorch module.  Returns (B, O)."""
    x_tbd = jnp.transpose(x, (1, 0, 2))                # (T, B, D)
    xg = lstm_input_projection(x_tbd, params["w_ih_t"], params["b_gates"])
    return lstm_recurrence_fc(xg, params["w_hh_t"], params["w_fc_t"],
                              params["b_fc"])


def forward_reference(params, x):
    """Pure-JAX reference (same math, no Pallas) for a correctness check."""
    B, T, D = x.shape
    H = params["w_hh_t"].shape[0]
    h = jnp.zeros((B, H), jnp.float32)
    c = jnp.zeros((B, H), jnp.float32)
    for t in range(T):
        gates = (x[:, t, :] @ params["w_ih_t"] + params["b_gates"]
                 + h @ params["w_hh_t"])
        i_g = jax.nn.sigmoid(gates[:, 0 * H:1 * H])
        f_g = jax.nn.sigmoid(gates[:, 1 * H:2 * H])
        g_g = jnp.tanh(gates[:, 2 * H:3 * H])
        o_g = jax.nn.sigmoid(gates[:, 3 * H:4 * H])
        c = f_g * c + i_g * g_g
        h = o_g * jnp.tanh(c)
    return h @ params["w_fc_t"] + params["b_fc"]


# ----------------------------------------------------------------------------
# Main
# ----------------------------------------------------------------------------

if __name__ == "__main__":
    B, T = 2, 8
    key = jax.random.PRNGKey(0)
    kx, kp = jax.random.split(key)
    x = jax.random.normal(kx, (B, T, INPUT_SIZE), jnp.float32)
    params = init_params(kp)

    out = jax.jit(forward)(params, x)
    out = jax.block_until_ready(out)
    assert out.shape == (B, OUTPUT_SIZE), out.shape

    ref = forward_reference(params, x)
    assert jnp.allclose(out, ref, rtol=1e-3, atol=1e-3), (out, ref)

    print("KERNEL_OK")
</pallas_src>

<mosaic_0001>
module attributes {stable_mosaic.version = 11 : i64} {
  func.func @_input_proj_kernel(%arg0: i32, %arg1: memref<16x16xf32, #tpu.memory_space<vmem>>, %arg2: memref<16x128xf32, #tpu.memory_space<vmem>>, %arg3: memref<1x128xf32, #tpu.memory_space<vmem>>, %arg4: memref<16x128xf32, #tpu.memory_space<vmem>>) attributes {dimension_semantics = [#tpu.dimension_semantics<parallel>], iteration_bounds = array<i64: 1>, scalar_prefetch = 0 : i64, scratch_operands = 0 : i64, tpu.core_type = #tpu.core_type<tc>, window_params = [{transform_indices = @transform_0, window_bounds = array<i64: 16, 16>}, {pipeline_mode = #tpu.pipeline_mode<synchronous>, transform_indices = @transform_1, window_bounds = array<i64: 16, 128>}, {pipeline_mode = #tpu.pipeline_mode<synchronous>, transform_indices = @transform_2, window_bounds = array<i64: 1, 128>}, {transform_indices = @transform_3, window_bounds = array<i64: 16, 128>}]} {
    %c0 = arith.constant 0 : index
    %c0_0 = arith.constant 0 : index
    %0 = vector.load %arg1[%c0, %c0_0] : memref<16x16xf32, #tpu.memory_space<vmem>>, vector<16x16xf32>
    %c0_1 = arith.constant 0 : index
    %c0_2 = arith.constant 0 : index
    %1 = vector.load %arg2[%c0_1, %c0_2] : memref<16x128xf32, #tpu.memory_space<vmem>>, vector<16x128xf32>
    %cst = arith.constant dense<0.000000e+00> : vector<16x128xf32>
    %2 = tpu.matmul %0, %1, %cst {dimension_numbers = #tpu.dot_dimension_numbers<[1], [0], [0], [1], [0, 0, 1, 1], [], []>} : vector<16x16xf32>, vector<16x128xf32>, vector<16x128xf32> -> vector<16x128xf32>
    %c0_3 = arith.constant 0 : index
    %c0_4 = arith.constant 0 : index
    %3 = vector.load %arg3[%c0_3, %c0_4] : memref<1x128xf32, #tpu.memory_space<vmem>>, vector<1x128xf32>
    %4 = vector.broadcast %3 : vector<1x128xf32> to vector<16x128xf32>
    %5 = arith.addf %2, %4 : vector<16x128xf32>
    %c0_5 = arith.constant 0 : index
    %c0_6 = arith.constant 0 : index
    %6 = vector.load %arg4[%c0_5, %c0_6] : memref<16x128xf32, #tpu.memory_space<vmem>>, vector<16x128xf32>
    tpu.vector_store %arg4[%c0_5, %c0_6], %5 {strides = array<i32>} : memref<16x128xf32, #tpu.memory_space<vmem>>, vector<16x128xf32>,
    return
  }
  func.func @transform_0(%arg0: i32) -> (i32, i32) {
    %c0_i32 = arith.constant 0 : i32
    %c0_i32_0 = arith.constant 0 : i32
    return %arg0, %c0_i32 : i32, i32
  }
  func.func @transform_1(%arg0: i32) -> (i32, i32) {
    %c0_i32 = arith.constant 0 : i32
    %c0_i32_0 = arith.constant 0 : i32
    %c0_i32_1 = arith.constant 0 : i32
    return %c0_i32, %c0_i32_0 : i32, i32
  }
  func.func @transform_2(%arg0: i32) -> (i32, i32) {
    %c0_i32 = arith.constant 0 : i32
    %c0_i32_0 = arith.constant 0 : i32
    %c0_i32_1 = arith.constant 0 : i32
    return %c0_i32, %c0_i32_0 : i32, i32
  }
  func.func @transform_3(%arg0: i32) -> (i32, i32) {
    %c0_i32 = arith.constant 0 : i32
    %c0_i32_0 = arith.constant 0 : i32
    return %arg0, %c0_i32 : i32, i32
  }
}

module attributes {stable_mosaic.version = 11 : i64} {
  func.func @_lstm_step_kernel(%arg0: i32, %arg1: memref<1x2x128xf32, #tpu.memory_space<vmem>>, %arg2: memref<32x128xf32, #tpu.memory_space<vmem>>, %arg3: memref<32x6xf32, #tpu.memory_space<vmem>>, %arg4: memref<1x6xf32, #tpu.memory_space<vmem>>, %arg5: memref<2x6xf32, #tpu.memory_space<vmem>>, %arg6: memref<2x32xf32, #tpu.memory_space<vmem>>, %arg7: memref<2x32xf32, #tpu.memory_space<vmem>>) attributes {dimension_semantics = [#tpu.dimension_semantics<arbitrary>], iteration_bounds = array<i64: 8>, scalar_prefetch = 0 : i64, scratch_operands = 2 : i64, tpu.core_type = #tpu.core_type<tc>, window_params = [{transform_indices = @transform_0, window_bounds = array<i64: 1, 2, 128>}, {pipeline_mode = #tpu.pipeline_mode<synchronous>, transform_indices = @transform_1, window_bounds = array<i64: 32, 128>}, {pipeline_mode = #tpu.pipeline_mode<synchronous>, transform_indices = @transform_2, window_bounds = array<i64: 32, 6>}, {pipeline_mode = #tpu.pipeline_mode<synchronous>, transform_indices = @transform_3, window_bounds = array<i64: 1, 6>}, {pipeline_mode = #tpu.pipeline_mode<synchronous>, transform_indices = @transform_4, window_bounds = array<i64: 2, 6>}]} {
    %c0_i32 = arith.constant 0 : i32
    %0 = arith.cmpi eq, %arg0, %c0_i32 : i32
    %1 = arith.extui %0 : i1 to i32
    %c0_i32_0 = arith.constant 0 : i32
    %2 = arith.cmpi ne, %1, %c0_i32_0 : i32
    scf.if %2 {
      %cst_17 = arith.constant 0.000000e+00 : f32
      %40 = vector.broadcast %cst_17 : f32 to vector<2x32xf32>
      %c0_18 = arith.constant 0 : index
      %c0_19 = arith.constant 0 : index
      %41 = vector.load %arg6[%c0_18, %c0_19] : memref<2x32xf32, #tpu.memory_space<vmem>>, vector<2x32xf32>
      tpu.vector_store %arg6[%c0_18, %c0_19], %40 {strides = array<i32>} : memref<2x32xf32, #tpu.memory_space<vmem>>, vector<2x32xf32>,
      %cst_20 = arith.constant 0.000000e+00 : f32
      %42 = vector.broadcast %cst_20 : f32 to vector<2x32xf32>
      %c0_21 = arith.constant 0 : index
      %c0_22 = arith.constant 0 : index
      %43 = vector.load %arg7[%c0_21, %c0_22] : memref<2x32xf32, #tpu.memory_space<vmem>>, vector<2x32xf32>
      tpu.vector_store %arg7[%c0_21, %c0_22], %42 {strides = array<i32>} : memref<2x32xf32, #tpu.memory_space<vmem>>, vector<2x32xf32>,
    } else {
    }
    %c0 = arith.constant 0 : index
    %c0_1 = arith.constant 0 : index
    %c0_2 = arith.constant 0 : index
    %3 = vector.load %arg1[%c0, %c0_1, %c0_2] : memref<1x2x128xf32, #tpu.memory_space<vmem>>, vector<1x2x128xf32>
    %4 = vector.shape_cast %3 : vector<1x2x128xf32> to vector<2x128xf32>
    %c0_3 = arith.constant 0 : index
    %c0_4 = arith.constant 0 : index
    %5 = vector.load %arg6[%c0_3, %c0_4] : memref<2x32xf32, #tpu.memory_space<vmem>>, vector<2x32xf32>
    %c0_5 = arith.constant 0 : index
    %c0_6 = arith.constant 0 : index
    %6 = vector.load %arg2[%c0_5, %c0_6] : memref<32x128xf32, #tpu.memory_space<vmem>>, vector<32x128xf32>
    %cst = arith.constant dense<0.000000e+00> : vector<2x128xf32>
    %7 = tpu.matmul %5, %6, %cst {dimension_numbers = #tpu.dot_dimension_numbers<[1], [0], [0], [1], [0, 0, 1, 1], [], []>} : vector<2x32xf32>, vector<32x128xf32>, vector<2x128xf32> -> vector<2x128xf32>
    %8 = arith.addf %4, %7 : vector<2x128xf32>
    %9 = vector.extract_strided_slice %8 {offsets = [0, 0], sizes = [2, 32], strides = [1, 1]} : vector<2x128xf32> to vector<2x32xf32>
    %10 = arith.negf %9 : vector<2x32xf32>
    %11 = math.exp %10 : vector<2x32xf32>
    %cst_7 = arith.constant 1.000000e+00 : f32
    %12 = vector.broadcast %cst_7 : f32 to vector<2x32xf32>
    %13 = arith.addf %12, %11 : vector<2x32xf32>
    %14 = arith.divf %12, %13 : vector<2x32xf32>
    %15 = vector.extract_strided_slice %8 {offsets = [0, 32], sizes = [2, 32], strides = [1, 1]} : vector<2x128xf32> to vector<2x32xf32>
    %16 = arith.negf %15 : vector<2x32xf32>
    %17 = math.exp %16 : vector<2x32xf32>
    %cst_8 = arith.constant 1.000000e+00 : f32
    %18 = vector.broadcast %cst_8 : f32 to vector<2x32xf32>
    %19 = arith.addf %18, %17 : vector<2x32xf32>
    %20 = arith.divf %18, %19 : vector<2x32xf32>
    %21 = vector.extract_strided_slice %8 {offsets = [0, 64], sizes = [2, 32], strides = [1, 1]} : vector<2x128xf32> to vector<2x32xf32>
    %22 = math.tanh %21 : vector<2x32xf32>
    %23 = vector.extract_strided_slice %8 {offsets = [0, 96], sizes = [2, 32], strides = [1, 1]} : vector<2x128xf32> to vector<2x32xf32>
    %24 = arith.negf %23 : vector<2x32xf32>
    %25 = math.exp %24 : vector<2x32xf32>
    %cst_9 = arith.constant 1.000000e+00 : f32
    %26 = vector.broadcast %cst_9 : f32 to vector<2x32xf32>
    %27 = arith.addf %26, %25 : vector<2x32xf32>
    %28 = arith.divf %26, %27 : vector<2x32xf32>
    %c0_10 = arith.constant 0 : index
    %c0_11 = arith.constant 0 : index
    %29 = vector.load %arg7[%c0_10, %c0_11] : memref<2x32xf32, #tpu.memory_space<vmem>>, vector<2x32xf32>
    %30 = arith.mulf %20, %29 : vector<2x32xf32>
    %31 = arith.mulf %14, %22 : vector<2x32xf32>
    %32 = arith.addf %30, %31 : vector<2x32xf32>
    %33 = math.tanh %32 : vector<2x32xf32>
    %34 = arith.mulf %28, %33 : vector<2x32xf32>
    %c0_12 = arith.constant 0 : index
    %c0_13 = arith.constant 0 : index
    %35 = vector.load %arg7[%c0_12, %c0_13] : memref<2x32xf32, #tpu.memory_space<vmem>>, vector<2x32xf32>
    tpu.vector_store %arg7[%c0_12, %c0_13], %32 {strides = array<i32>} : memref<2x32xf32, #tpu.memory_space<vmem>>, vector<2x32xf32>,
    %c0_14 = arith.constant 0 : index
    %c0_15 = arith.constant 0 : index
    %36 = vector.load %arg6[%c0_14, %c0_15] : memref<2x32xf32, #tpu.memory_space<vmem>>, vector<2x32xf32>
    tpu.vector_store %arg6[%c0_14, %c0_15], %34 {strides = array<i32>} : memref<2x32xf32, #tpu.memory_space<vmem>>, vector<2x32xf32>,
    %c7_i32 = arith.constant 7 : i32
    %37 = arith.cmpi eq, %arg0, %c7_i32 : i32
    %38 = arith.extui %37 : i1 to i32
    %c0_i32_16 = arith.constant 0 : i32
    %39 = arith.cmpi ne, %38, %c0_i32_16 : i32
    scf.if %39 {
      %c0_17 = arith.constant 0 : index
      %c0_18 = arith.constant 0 : index
      %40 = vector.load %arg3[%c0_17, %c0_18] : memref<32x6xf32, #tpu.memory_space<vmem>>, vector<32x6xf32>
      %cst_19 = arith.constant dense<0.000000e+00> : vector<2x6xf32>
      %41 = tpu.matmul %34, %40, %cst_19 {dimension_numbers = #tpu.dot_dimension_numbers<[1], [0], [0], [1], [0, 0, 1, 1], [], []>} : vector<2x32xf32>, vector<32x6xf32>, vector<2x6xf32> -> vector<2x6xf32>
      %c0_20 = arith.constant 0 : index
      %c0_21 = arith.constant 0 : index
      %42 = vector.load %arg4[%c0_20, %c0_21] : memref<1x6xf32, #tpu.memory_space<vmem>>, vector<1x6xf32>
      %43 = vector.broadcast %42 : vector<1x6xf32> to vector<2x6xf32>
      %44 = arith.addf %41, %43 : vector<2x6xf32>
      %c0_22 = arith.constant 0 : index
      %c0_23 = arith.constant 0 : index
      %45 = vector.load %arg5[%c0_22, %c0_23] : memref<2x6xf32, #tpu.memory_space<vmem>>, vector<2x6xf32>
      tpu.vector_store %arg5[%c0_22, %c0_23], %44 {strides = array<i32>} : memref<2x6xf32, #tpu.memory_space<vmem>>, vector<2x6xf32>,
    } else {
    }
    return
  }
  func.func @transform_0(%arg0: i32) -> (i32, i32, i32) {
    %c0_i32 = arith.constant 0 : i32
    %c0_i32_0 = arith.constant 0 : i32
    %c0_i32_1 = arith.constant 0 : i32
    return %arg0, %c0_i32, %c0_i32_0 : i32, i32, i32
  }
  func.func @transform_1(%arg0: i32) -> (i32, i32) {
    %c0_i32 = arith.constant 0 : i32
    %c0_i32_0 = arith.constant 0 : i32
    %c0_i32_1 = arith.constant 0 : i32
    return %c0_i32, %c0_i32_0 : i32, i32
  }
  func.func @transform_2(%arg0: i32) -> (i32, i32) {
    %c0_i32 = arith.constant 0 : i32
    %c0_i32_0 = arith.constant 0 : i32
    %c0_i32_1 = arith.constant 0 : i32
    return %c0_i32, %c0_i32_0 : i32, i32
  }
  func.func @transform_3(%arg0: i32) -> (i32, i32) {
    %c0_i32 = arith.constant 0 : i32
    %c0_i32_0 = arith.constant 0 : i32
    %c0_i32_1 = arith.constant 0 : i32
    return %c0_i32, %c0_i32_0 : i32, i32
  }
  func.func @transform_4(%arg0: i32) -> (i32, i32) {
    %c0_i32 = arith.constant 0 : i32
    %c0_i32_0 = arith.constant 0 : i32
    %c0_i32_1 = arith.constant 0 : i32
    return %c0_i32, %c0_i32_0 : i32, i32
  }
}

</mosaic_0001>

<bundles_post_ra>
// kernel: forward.2
= control target key start
LH: loop header
LB: loop body
LE: loop exit
PB: predicated region body
PF: predicated region fallthrough
CT: control target
= control target key end

     0   :  { %vm22_vm0 = vcmask 130048   ;;  %s104_s1 = inlined_call_operand.vmem [shape: f32[16,128], index: 1, kind: input, shape index: {}]   ;;  %s105_s0 = inlined_call_operand.vmem [shape: f32[16,16], index: 0, kind: input, shape index: {}]   ;;  %s106_s2 = inlined_call_operand.vmem [shape: f32[1,128], index: 2, kind: input, shape index: {}]   ;;  %s107_s3 = inlined_call_operand.vmem [shape: f32[16,128], index: 3, kind: output, shape index: {}]  }
   0x1   :  { %v17_v0 = vld [vmem:[%s104_s1 + $0x8] sm:$0xff]  ;;  %v16_v1 = vld [vmem:[%s104_s1] sm:$0xff] }
   0x2   :  { %43 = vmatpush.msra.mxu0 %v17_v0  ;;  %60 = vmatpush.msra.mxu1 %v17_v0  ;;  %v14_v2 = vld [vmem:[%s105_s0] sm:$0xff]  ;;  %v15_v3 = vld [vmem:[%s105_s0 + $0x8] sm:$0xff] }
   0x3   :  { %v62_v4 = vld [vmem:[%s106_s2] ss:$0 sm:$0xff] }
   0x4   :  { %44 = vmatpush.msra.mxu0 %v16_v1  ;;  %61 = vmatpush.msra.mxu1 %v16_v1 }
   0x5   :  { %58 = vmatmul.msk.f32.vlgmr.msra.gmra.mxu0 %vm22_vm0, %v14_v2  ;;  %59 = vmatmul.msk.f32.vlgmr.msra.gmra.mxu1 %vm22_vm0, %v15_v3 }
  0x82   :  { %v46_v5 = vpop.f32.mrf.mxu0  ;;  %v49_v6 = vpop.f32.mrf.mxu1 }
  0x83   :  { %v47_v7 = vadd.f32 %v62_v4, %v46_v5  ;;  %v50_v8 = vadd.f32 %v62_v4, %v49_v6 }
  0x85   :  { %52 = vst [vmem:[%s107_s3] sm:$0xff] %v47_v7 }
  0x86   :  { %53 = vst [vmem:[%s107_s3 + $0x8] sm:$0xff] %v50_v8 }

// kernel: forward.3
= control target key start
LH: loop header
LB: loop body
LE: loop exit
PB: predicated region body
PF: predicated region fallthrough
CT: control target
= control target key end

     0   :  { %9 = vsyncpa [#allocation5], 0  ;;  %s468_s15 = smov 0   ;;  %s526_s0 = inlined_call_operand.vmem [shape: f32[8,2,128], index: 0, kind: input, shape index: {}]   ;;  %s527_s1 = inlined_call_operand.vmem [shape: f32[32,128], index: 1, kind: input, shape index: {}]   ;;  %s528_s2 = inlined_call_operand.vmem [shape: f32[32,6], index: 2, kind: input, shape index: {}]   ;;  %s529_s3 = inlined_call_operand.vmem [shape: f32[1,6], index: 3, kind: input, shape index: {}]   ;;  %s530_s4 = inlined_call_operand.hbm [shape: f32[2,6], index: 4, kind: output, shape index: {}]  }
   0x1 LB: > { %s474_s16 = sadd.s32 4294967295, %s436_s15   ;;  %p359_p0 = scmp.ge.s32.totalorder %s436_s15, 1  ;;  %s436_s15 = sphi %s468_s15, %s15_s15  }
   0x2   : > { %p157_p1 = scmp.lt.s32.totalorder %s436_s15, 9 }
   0x4   : > { %p158_p2 = pnand %p359_p0, %p157_p1 }
   0x5   : > { %p177_p3 = scmp.lt.s32.totalorder (!%p158_p2), %s474_s16, 7  ;;  %p361_p4 = scmp.ne.s32.totalorder (!%p158_p2), %s474_s16, 0 }
   0x6   : > { %161 = sbr.rel (%p158_p2) target bundleno = 755 (0x2f3), region = 36 }
   0xb   : > { %s178_s17 = scalar_select %p177_p3, %s474_s16, 7 }
   0xc   : > { %184 = sbr.rel (%p361_p4) target bundleno = 20 (0x14), region = 40 }
   0xd   : > { %s360_s18 = sshll.u32 %s178_s17, 1 }
   0xe   : > { %s180_s21 = scalar_lea.vmem %s526_s0, %s360_s18 }
  0x11   : > { %vm185_vm0 = vcmask 254976   ;;  %v438_v0 = vmov 0.0  }
  0x12   : > { %186 = vst.msk [vmem:[#allocation2] sm:$0x3] %vm185_vm0, %v438_v0 }
  0x13   : > { %187 = vst.msk [vmem:[#allocation3] sm:$0x3] %vm185_vm0, %v438_v0 }
  0x14 PF: > { %v193_v1 = vld [vmem:[%s527_s1 + $0x18] sm:$0xff]  ;;  %v192_v2 = vld [vmem:[%s527_s1 + $0x10] sm:$0xff]  ;;  %v191_v3 = vld [vmem:[%s527_s1 + $0x8] sm:$0xff]  ;;  %vm194_vm1 = vcmask 261120   ;;  %s439_s30 = smov 64   ;;  %s440_s5 = smov 32  }
  0x15   : > { %210 = vmatpush.msra.mxu0 %v193_v1  ;;  %v190_v4 = vld [vmem:[%s527_s1] sm:$0xff]  ;;  %s441_s6 = smov 96   ;;  %vm265_vm6 = vcmask 254976   ;;  %p364_p5 = scmp.ne.s32.totalorder %s474_s16, 7 }
  0x16   : > { %v188_v6 = vld [vmem:[%s180_s21] sm:$0x3] }
  0x17   : > { %211 = vmatpush.msra.mxu0 %v192_v2 }
  0x19   : > { %212 = vmatpush.msra.mxu0 %v191_v3  ;;  %v189_v5 = vld [vmem:[#allocation2] sm:$0x3] }
  0x1a   : > { %v239_v10 = vld [vmem:[#allocation3] sm:$0x3] }
  0x1b   : > { %213 = vmatpush.msra.mxu0 %v190_v4 }
  0x1c   : > { %362 = vmatmul.msk.f32.vlgmr.msra.gmra.mxu0 %vm194_vm1, %v189_v5 }
  0x99   : > { %v215_v7 = vpop.f32.mrf.mxu0 }
  0x9a   : > { %v218_v8 = vadd.f32 %v215_v7, %v188_v6 }
  0x9c   : > { %389 = vtanh.f32 %v218_v8  ;;  %v363_v11 = vmul.f32 -1.442695, %v218_v8 }
  0x9e   : > { %391 = vpow2.f32 %v363_v11 }
  0xa2   : > { %v390_v9 = vpop.eup %389 }
  0xa3   : > { %246 = vrot.lane.b32.xlu0 %v390_v9, %s439_s30 }
  0xa4   : > { %v392_v12 = vpop.eup %391 }
  0xa5   : > { %v222_v13 = vadd.f32 1.0, %v392_v12 }
  0xa7   : > { %393 = vrcp.f32 %v222_v13  ;;  %v234_v19 = vand.u32 2147483648, %v222_v13  ;;  %vm228_vm3 = vweird.f32 %v222_v13  ;;  %v232_v20 = vand.u32 2147483647, %v222_v13 }
  0xa9   : > { %v235_v22 = vor.u32 1.1754944e-38, %v234_v19  ;;  %vm233_vm5 = vcmp.eq.f32.partialorder %v232_v20, 8.507059e+37 }
  0xab   : > { %241 = vrot.lane.b32.xlu0 %v239_v10, %s440_s5 }
  0xad   : > { %v394_v14 = vpop.eup %393 }
  0xae   : > { %v224_v15 = vmul.f32 %v394_v14, %v222_v13  ;;  %vm229_vm2 = vweird.f32 %v394_v14 }
  0xaf   : > { %vm230_vm4 = vmor %vm228_vm3, %vm229_vm2 }
  0xb0   : > { %v225_v16 = vsub.f32 1.0, %v224_v15 }
  0xb2   : > { %v226_v17 = vmul.f32 %v394_v14, %v225_v16 }
  0xb4   : > { %v227_v18 = vadd.f32 %v394_v14, %v226_v17 }
  0xb6   : > { %v231_v21 = vsel %vm230_vm4, %v394_v14, %v227_v18 }
  0xb7   : > { %v236_v24 = vsel %vm233_vm5, %v235_v22, %v231_v21 }
 0x115   : > { %v247_v23 = vpop.permute.xlu0 %246 }
 0x116   : > { %v249_v25 = vmul.f32 %v247_v23, %v236_v24 }
 0x118   : > { %251 = vrot.lane.b32.xlu1 %v249_v25, %s440_s5 }
 0x11d   : > { %v242_v26 = vpop.permute.xlu0 %241 }
 0x11e   : > { %v244_v27 = vmul.f32 %v242_v26, %v236_v24 }
 0x18a   : > { %v252_v28 = vpop.permute.xlu1 %251 }
 0x18b   : > { %v254_v29 = vadd.f32 %v252_v28, %v244_v27 }
 0x18d   : > { %395 = vtanh.f32 %v254_v29  ;;  %262 = vrot.lane.b32.xlu2 %v254_v29, %s441_s6 }
 0x193   : > { %v396_v30 = vpop.eup %395 }
 0x194   : > { %257 = vrot.lane.b32.xlu1 %v396_v30, %s439_s30 }
 0x1e7   : > { %v263_v31 = vpop.permute.xlu2 %262 }
 0x1e8   : > { %266 = vst.msk [vmem:[#allocation3] sm:$0x3] %vm265_vm6, %v263_v31 }
 0x206   : > { %v258_v32 = vpop.permute.xlu1 %257 }
 0x207   : > { %v260_v33 = vmul.f32 %v258_v32, %v236_v24 }
 0x209   : > { %268 = vrot.lane.b32.xlu2 %v260_v33, %s440_s5 }
 0x260   : > { %275 = sbr.rel (%p364_p5) target bundleno = 750 (0x2ee), region = 44 }
 0x263   : > { %v269_v34 = vpop.permute.xlu2 %268 }
 0x264   : > { %271 = vst.msk [vmem:[#allocation2] sm:$0x3] %vm265_vm6, %v269_v34 }
 0x265   : > { %v279_v35 = vld [vmem:[%s528_s2 + $0x18] sm:$0xff]  ;;  %v278_v36 = vld [vmem:[%s528_s2 + $0x10] sm:$0xff]  ;;  %v277_v37 = vld [vmem:[%s528_s2 + $0x8] sm:$0xff]  ;;  %vm306_vm7 = vcmask 41984  }
 0x266   : > { %298 = vmatpush.msra.mxu0 %v279_v35  ;;  %v276_v38 = vld [vmem:[%s528_s2] sm:$0xff] }
 0x267   : > { %v397_v39 = vld [vmem:[%s529_s3] ss:$0 sm:$0xff] }
 0x268   : > { %299 = vmatpush.msra.mxu0 %v278_v36 }
 0x26a   : > { %300 = vmatpush.msra.mxu0 %v277_v37 }
 0x26c   : > { %301 = vmatpush.msra.mxu0 %v276_v38 }
 0x26d   : > { %365 = vmatmul.msk.f32.vlgmr.msra.gmra.mxu0 %vm194_vm1, %v269_v34 }
 0x2ea   : > { %v303_v40 = vpop.f32.mrf.mxu0 }
 0x2eb   : > { %v304_v41 = vadd.f32 %v397_v39, %v303_v40 }
 0x2ed   : > { %307 = vst.msk [vmem:[#allocation4] sm:$0x3] %vm306_vm7, %v304_v41 }
 0x2ee PF: > { %p374_p6 = scmp.eq.s32.totalorder %s474_s16, 7  ;;  %s442_s19 = smov [#allocation4]  }
 0x2ef   : > { %s314_s20 = sshll.u32 %s442_s19, 4  ;;  %s316_s23 = sshll.u32 %s530_s4, 4  ;;  %s315_s20 = int_to_ptr.vmem [resolvable:$true] %s314_s20  ;;  %s317_s23 = int_to_ptr.hbm [resolvable:$true] %s316_s23 }
 0x2f0   : > { %371 = dma.vmem_to_hbm [thread:$0]  (%p374_p6), %s315_s20, 32, %s317_s23, [#allocation5]  }
 0x2f1   : > { %431 = dma.done.wait (%p374_p6), [#allocation5], 32  }
 0x2f2   : > { %433 = vsyncadd (%p374_p6), [#allocation5], 4294967264 }
 0x2f3 PF: > { %s15_s15 = sadd.s32 1, %s436_s15  }
 0x2f4   : > { %p12_p7 = scmp.ge.s32.totalorder %s15_s15, 10  }
 0x2f6   :  { %14 = sbr.rel (!%p12_p7) target bundleno = 1 (0x1), region = 71 }
 0x2fb   :  { %330 = vsyncpa [#allocation5], 1 }
 0x2fc   :  { %332 = vsyncpa [#allocation5 + $0x1], 1 }

</bundles_post_ra>
